<compile_context>
chip_gen: v7x
topology: tpu7x:2x2x1
jax: 0.10.0
libtpu: 0.0.40
codegen_flags: <defaults>
</compile_context>

<pallas_src>
import functools

import jax
import jax.numpy as jnp
from jax.experimental import pallas as pl
from jax.experimental.pallas import tpu as pltpu

FEAT = 16          # Linear in/out features
PACK = 128 // FEAT  # 8 rows packed per 128-lane register row


def _gelu_ish_linear_kernel(x_ref, wblk_ref, b_ref, o_ref):
    # x_ref:    (TM, 128)  packed rows (8 original rows of 16 features each)
    # wblk_ref: (128, 128) block-diagonal kron(I_8, W^T)
    # b_ref:    (1, 128)   bias tiled 8x
    # o_ref:    (TM, 128)
    x1 = jnp.dot(x_ref[...], wblk_ref[...],
                 preferred_element_type=jnp.float32) + b_ref[...].astype(jnp.float32)
    x2 = x1 * 0.5
    x3 = x1 + x1 * x1 * x1 * 0.044715
    x7 = x2 * (jnp.tanh(x3) + 1.0)
    o_ref[...] = x7.astype(o_ref.dtype)


def _round_up(n, m):
    return ((n + m - 1) // m) * m


@functools.partial(jax.jit, static_argnames=("tm",))
def model_forward(x, weight, bias, *, tm=512):
    """x: [..., 16]; weight: [16, 16] (out, in); bias: [16]."""
    orig_shape = x.shape
    assert orig_shape[-1] == FEAT
    rows = 1
    for d in orig_shape[:-1]:
        rows *= d

    x2d = x.reshape(rows, FEAT)

    # --- lane-dense repack: (rows,16) -> (rows_packed, 128) -----------------
    rows_packed_raw = pl.cdiv(rows, PACK)
    tm_eff = min(tm, _round_up(rows_packed_raw, 8))      # small inputs: 1 tile
    rows_packed = _round_up(rows_packed_raw, tm_eff)
    rows_padded = rows_packed * PACK

    if rows_padded != rows:
        x2d = jnp.pad(x2d, ((0, rows_padded - rows), (0, 0)))
    x_packed = x2d.reshape(rows_packed, PACK * FEAT)      # (rows_packed, 128)

    # Block-diagonal W^T (128x128) and tiled bias (1x128).
    wblk = jnp.kron(jnp.eye(PACK, dtype=weight.dtype), weight.T)
    b_tiled = jnp.tile(bias, PACK).reshape(1, PACK * FEAT)

    grid = (rows_packed // tm_eff,)

    out_packed = pl.pallas_call(
        _gelu_ish_linear_kernel,
        out_shape=jax.ShapeDtypeStruct((rows_packed, PACK * FEAT), x.dtype),
        grid_spec=pltpu.PrefetchScalarGridSpec(
            num_scalar_prefetch=0,
            grid=grid,
            in_specs=[
                pl.BlockSpec((tm_eff, PACK * FEAT), lambda i: (i, 0)),
                pl.BlockSpec((PACK * FEAT, PACK * FEAT), lambda i: (0, 0)),
                pl.BlockSpec((1, PACK * FEAT), lambda i: (0, 0)),
            ],
            out_specs=pl.BlockSpec((tm_eff, PACK * FEAT), lambda i: (i, 0)),
        ),
        compiler_params=pltpu.CompilerParams(
            dimension_semantics=("parallel",),
        ),
    )(x_packed, wblk, b_tiled)

    out2d = out_packed.reshape(rows_padded, FEAT)[:rows]
    return out2d.reshape(orig_shape)


def _reference(x, weight, bias):
    x1 = jnp.einsum("...i,oi->...o", x, weight) + bias
    x2 = x1 * 0.5
    x3 = x1 + x1 * x1 * x1 * 0.044715
    return x2 * (jnp.tanh(x3) + 1.0)


if __name__ == "__main__":
    key = jax.random.PRNGKey(0)
    kx, kw, kb = jax.random.split(key, 3)

    # Small shape consistent with the module: B=2, H=W=5, C=16 (channels-last,
    # since Linear(16,16) acts on the last dim).
    x = jax.random.normal(kx, (2, 5, 5, 16), dtype=jnp.float32)

    # Deterministic Linear(16, 16) params (PyTorch-style uniform init bounds).
    bound = 1.0 / (16.0 ** 0.5)
    weight = jax.random.uniform(kw, (16, 16), jnp.float32, -bound, bound)
    bias = jax.random.uniform(kb, (16,), jnp.float32, -bound, bound)

    out = model_forward(x, weight, bias)
    jax.block_until_ready(out)

    ref = _reference(x, weight, bias)
    assert out.shape == (2, 5, 5, 16)
    assert jnp.allclose(out, ref, atol=1e-5, rtol=1e-5)

    print("KERNEL_OK")
</pallas_src>

<mosaic_0001>
module attributes {stable_mosaic.version = 11 : i64} {
  func.func @_gelu_ish_linear_kernel(%arg0: i32, %arg1: memref<8x128xf32, #tpu.memory_space<vmem>>, %arg2: memref<128x128xf32, #tpu.memory_space<vmem>>, %arg3: memref<1x128xf32, #tpu.memory_space<vmem>>, %arg4: memref<8x128xf32, #tpu.memory_space<vmem>>) attributes {dimension_semantics = [#tpu.dimension_semantics<parallel>], iteration_bounds = array<i64: 1>, scalar_prefetch = 0 : i64, scratch_operands = 0 : i64, tpu.core_type = #tpu.core_type<tc>, window_params = [{transform_indices = @transform_0, window_bounds = array<i64: 8, 128>}, {pipeline_mode = #tpu.pipeline_mode<synchronous>, transform_indices = @transform_1, window_bounds = array<i64: 128, 128>}, {pipeline_mode = #tpu.pipeline_mode<synchronous>, transform_indices = @transform_2, window_bounds = array<i64: 1, 128>}, {transform_indices = @transform_3, window_bounds = array<i64: 8, 128>}]} {
    %c0 = arith.constant 0 : index
    %c0_0 = arith.constant 0 : index
    %0 = vector.load %arg1[%c0, %c0_0] : memref<8x128xf32, #tpu.memory_space<vmem>>, vector<8x128xf32>
    %c0_1 = arith.constant 0 : index
    %c0_2 = arith.constant 0 : index
    %1 = vector.load %arg2[%c0_1, %c0_2] : memref<128x128xf32, #tpu.memory_space<vmem>>, vector<128x128xf32>
    %cst = arith.constant dense<0.000000e+00> : vector<8x128xf32>
    %2 = tpu.matmul %0, %1, %cst {dimension_numbers = #tpu.dot_dimension_numbers<[1], [0], [0], [1], [0, 0, 1, 1], [], []>} : vector<8x128xf32>, vector<128x128xf32>, vector<8x128xf32> -> vector<8x128xf32>
    %c0_3 = arith.constant 0 : index
    %c0_4 = arith.constant 0 : index
    %3 = vector.load %arg3[%c0_3, %c0_4] : memref<1x128xf32, #tpu.memory_space<vmem>>, vector<1x128xf32>
    %4 = vector.broadcast %3 : vector<1x128xf32> to vector<8x128xf32>
    %5 = arith.addf %2, %4 : vector<8x128xf32>
    %cst_5 = arith.constant 5.000000e-01 : f32
    %6 = vector.broadcast %cst_5 : f32 to vector<8x128xf32>
    %7 = arith.mulf %5, %6 : vector<8x128xf32>
    %8 = arith.mulf %5, %5 : vector<8x128xf32>
    %9 = arith.mulf %8, %5 : vector<8x128xf32>
    %cst_6 = arith.constant 4.471500e-02 : f32
    %10 = vector.broadcast %cst_6 : f32 to vector<8x128xf32>
    %11 = arith.mulf %9, %10 : vector<8x128xf32>
    %12 = arith.addf %5, %11 : vector<8x128xf32>
    %13 = math.tanh %12 : vector<8x128xf32>
    %cst_7 = arith.constant 1.000000e+00 : f32
    %14 = vector.broadcast %cst_7 : f32 to vector<8x128xf32>
    %15 = arith.addf %13, %14 : vector<8x128xf32>
    %16 = arith.mulf %7, %15 : vector<8x128xf32>
    %c0_8 = arith.constant 0 : index
    %c0_9 = arith.constant 0 : index
    %17 = vector.load %arg4[%c0_8, %c0_9] : memref<8x128xf32, #tpu.memory_space<vmem>>, vector<8x128xf32>
    tpu.vector_store %arg4[%c0_8, %c0_9], %16 {strides = array<i32>} : memref<8x128xf32, #tpu.memory_space<vmem>>, vector<8x128xf32>,
    return
  }
  func.func @transform_0(%arg0: i32) -> (i32, i32) {
    %c0_i32 = arith.constant 0 : i32
    %c0_i32_0 = arith.constant 0 : i32
    return %arg0, %c0_i32 : i32, i32
  }
  func.func @transform_1(%arg0: i32) -> (i32, i32) {
    %c0_i32 = arith.constant 0 : i32
    %c0_i32_0 = arith.constant 0 : i32
    %c0_i32_1 = arith.constant 0 : i32
    return %c0_i32, %c0_i32_0 : i32, i32
  }
  func.func @transform_2(%arg0: i32) -> (i32, i32) {
    %c0_i32 = arith.constant 0 : i32
    %c0_i32_0 = arith.constant 0 : i32
    %c0_i32_1 = arith.constant 0 : i32
    return %c0_i32, %c0_i32_0 : i32, i32
  }
  func.func @transform_3(%arg0: i32) -> (i32, i32) {
    %c0_i32 = arith.constant 0 : i32
    %c0_i32_0 = arith.constant 0 : i32
    return %arg0, %c0_i32 : i32, i32
  }
}

</mosaic_0001>

<bundles_post_ra>
// kernel: tile.8
= control target key start
LH: loop header
LB: loop body
LE: loop exit
PB: predicated region body
PF: predicated region fallthrough
CT: control target
= control target key end

     0   :  { %s22_s0 = inlined_call_operand.vmem [shape: f32[16], index: 0, kind: input, shape index: {}]   ;;  %s23_s1 = inlined_call_operand.vmem [shape: f32[8,16], index: 1, kind: output, shape index: {}]  }
   0x1   :  { %v4_v0 = vld [vmem:[%s22_s0] ss:$0 sm:$0xff] }
   0x2   :  { %5 = vst [vmem:[%s23_s1] sm:$0xff] %v4_v0 }

// kernel: tile.9
= control target key start
LH: loop header
LB: loop body
LE: loop exit
PB: predicated region body
PF: predicated region fallthrough
CT: control target
= control target key end

     0   :  { %s67_s10 = smov 112   ;;  %s68_s11 = smov 80   ;;  %vm3_vm0 = vcmask 130048   ;;  %vm9_vm1 = vcmask 1048448   ;;  %vm15_vm2 = vcmask 917248   ;;  %vm21_vm3 = vcmask 786048   ;;  %s111_s0 = inlined_call_operand.vmem [shape: f32[8,16], index: 0, kind: input, shape index: {}]   ;;  %s112_s1 = inlined_call_operand.vmem [shape: f32[1,128], index: 1, kind: output, shape index: {}]  }
   0x1   :  { %v53_v0 = vld [vmem:[%s111_s0 + $0x7] sm:$0x1]   ;;  %v55_v1 = vld [vmem:[%s111_s0 + $0x5] sm:$0x1]   ;;  %v54_v2 = vld [vmem:[%s111_s0 + $0x6] sm:$0x1]  }
   0x2   :  { %7 = vrot.lane.b32.xlu0 %v53_v0, %s67_s10  ;;  %19 = vrot.lane.b32.xlu1 %v55_v1, %s68_s11  ;;  %v56_v3 = vld [vmem:[%s111_s0 + $0x4] sm:$0x1]   ;;  %v2_v4 = vld [vmem:[%s111_s0] sm:$0x1]   ;;  %s69_s18 = smov 96   ;;  %s70_s19 = smov 64  }
   0x3   :  { %4 = vst.msk [vmem:[#allocation0] sm:$0x1] %vm3_vm0, %v2_v4   ;;  %v57_v5 = vld [vmem:[%s111_s0 + $0x3] sm:$0x1]   ;;  %v58_v6 = vld [vmem:[%s111_s0 + $0x2] sm:$0x1]  }
   0x4   :  { %s71_s24 = smov 48   ;;  %s72_s25 = smov 32   ;;  %v59_v7 = vld [vmem:[%s111_s0 + $0x1] sm:$0x1]   ;;  %vm27_vm4 = vcmask 654848   ;;  %vm33_vm5 = vcmask 523648  }
   0x5   :  { %s73_s0 = smov 16   ;;  %vm39_vm6 = vcmask 392448   ;;  %vm45_vm7 = vcmask 261248  }
   0x6   :  { %13 = vrot.lane.b32.xlu0 %v54_v2, %s69_s18  ;;  %25 = vrot.lane.b32.xlu1 %v56_v3, %s70_s19 }
   0xa   :  { %31 = vrot.lane.b32.xlu0 %v57_v5, %s71_s24  ;;  %37 = vrot.lane.b32.xlu1 %v58_v6, %s72_s25 }
   0xe   :  { %43 = vrot.lane.b32.xlu0 %v59_v7, %s73_s0 }
  0x74   :  { %v8_v8 = vpop.permute.xlu0 %7   ;;  %v20_v9 = vpop.permute.xlu1 %19  }
  0x75   :  { %10 = vst.msk [vmem:[#allocation0] sm:$0x1] %vm9_vm1, %v8_v8  }
  0x78   :  { %v14_v10 = vpop.permute.xlu0 %13   ;;  %v26_v11 = vpop.permute.xlu1 %25  }
  0x79   :  { %16 = vst.msk [vmem:[#allocation0] sm:$0x1] %vm15_vm2, %v14_v10  }
  0x7a   :  { %22 = vst.msk [vmem:[#allocation0] sm:$0x1] %vm21_vm3, %v20_v9  }
  0x7b   :  { %28 = vst.msk [vmem:[#allocation0] sm:$0x1] %vm27_vm4, %v26_v11  }
  0x7c   :  { %v32_v12 = vpop.permute.xlu0 %31   ;;  %v38_v13 = vpop.permute.xlu1 %37  }
  0x7d   :  { %34 = vst.msk [vmem:[#allocation0] sm:$0x1] %vm33_vm5, %v32_v12  }
  0x7e   :  { %40 = vst.msk [vmem:[#allocation0] sm:$0x1] %vm39_vm6, %v38_v13  }
  0x80   :  { %v44_v14 = vpop.permute.xlu0 %43  }
  0x81   :  { %46 = vst.msk [vmem:[#allocation0] sm:$0x1] %vm45_vm7, %v44_v14  }
  0x88   :  { %v50_v15 = vld [vmem:[#allocation0] sm:$0x1] }
  0x89   :  { %52 = vst [vmem:[%s112_s1] sm:$0x1] %v50_v15 }

// kernel: model_forward.1
= control target key start
LH: loop header
LB: loop body
LE: loop exit
PB: predicated region body
PF: predicated region fallthrough
CT: control target
= control target key end

     0   :  { %v203_v0 = vmov 0.0|0.0   ;;  %vm204_vm0 = vmmov 0   ;;  %v205_v4 = vmov 0.0   ;;  %s283_s1 = inlined_call_operand.vmem [shape: f32[128,128], index: 1, kind: input, shape index: {}]   ;;  %s284_s0 = inlined_call_operand.vmem [shape: f32[8,128], index: 0, kind: input, shape index: {}]   ;;  %s285_s2 = inlined_call_operand.vmem [shape: f32[1,128], index: 2, kind: input, shape index: {}]   ;;  %s286_s3 = inlined_call_operand.vmem [shape: f32[8,128], index: 3, kind: output, shape index: {}]  }
   0x1   :  { %174 = vmatprep.subr.bf16.mxu0 %v203_v0  ;;  %v15_v1 = vld [vmem:[%s283_s1] sm:$0xff]  ;;  %v16_v2 = vld [vmem:[%s283_s1 + $0x8] sm:$0xff]  ;;  %v17_v3 = vld [vmem:[%s283_s1 + $0x10] sm:$0xff]  ;;  %171 = vmatprep.mubr.msk.f32.mxu0 %vm204_vm0, %v205_v4 }
   0x2   :  { %v175_v5 = vpack.c.bf16 %v16_v2, %v15_v1  ;;  %v18_v6 = vld [vmem:[%s283_s1 + $0x18] sm:$0xff]  ;;  %v19_v8 = vld [vmem:[%s283_s1 + $0x20] sm:$0xff]  ;;  %v20_v9 = vld [vmem:[%s283_s1 + $0x28] sm:$0xff] }
   0x3   :  { %v178_v7 = vpack.c.bf16 %v18_v6, %v17_v3  ;;  %v181_v10 = vpack.c.bf16 %v20_v9, %v19_v8  ;;  %v21_v11 = vld [vmem:[%s283_s1 + $0x30] sm:$0xff]  ;;  %v22_v12 = vld [vmem:[%s283_s1 + $0x38] sm:$0xff]  ;;  %v23_v14 = vld [vmem:[%s283_s1 + $0x40] sm:$0xff] }
   0x4   :  { %176 = vmatpush3.bf16.msra.mxu0 %v175_v5  ;;  %v184_v13 = vpack.c.bf16 %v22_v12, %v21_v11  ;;  %v24_v15 = vld [vmem:[%s283_s1 + $0x48] sm:$0xff]  ;;  %v25_v17 = vld [vmem:[%s283_s1 + $0x50] sm:$0xff]  ;;  %v26_v18 = vld [vmem:[%s283_s1 + $0x58] sm:$0xff] }
   0x5   :  { %177 = vmatprep.subr.bf16.mxu0 %v203_v0  ;;  %v187_v16 = vpack.c.bf16 %v24_v15, %v23_v14  ;;  %v190_v19 = vpack.c.bf16 %v26_v18, %v25_v17  ;;  %v27_v20 = vld [vmem:[%s283_s1 + $0x60] sm:$0xff]  ;;  %v28_v21 = vld [vmem:[%s283_s1 + $0x68] sm:$0xff]  ;;  %v29_v23 = vld [vmem:[%s283_s1 + $0x70] sm:$0xff] }
   0x6   :  { %v193_v22 = vpack.c.bf16 %v28_v21, %v27_v20  ;;  %v30_v24 = vld [vmem:[%s283_s1 + $0x78] sm:$0xff]  ;;  %v14_v26 = vld [vmem:[%s284_s0] sm:$0xff] }
   0x7   :  { %v196_v25 = vpack.c.bf16 %v30_v24, %v29_v23  ;;  %v121_v27 = vld [vmem:[%s285_s2] ss:$0 sm:$0xff] }
   0x8   :  { %179 = vmatpush3.bf16.msra.mxu0 %v178_v7 }
   0x9   :  { %180 = vmatprep.subr.bf16.mxu0 %v203_v0 }
   0xc   :  { %182 = vmatpush3.bf16.msra.mxu0 %v181_v10 }
   0xd   :  { %183 = vmatprep.subr.bf16.mxu0 %v203_v0 }
  0x10   :  { %185 = vmatpush3.bf16.msra.mxu0 %v184_v13 }
  0x11   :  { %186 = vmatprep.subr.bf16.mxu0 %v203_v0 }
  0x14   :  { %188 = vmatpush3.bf16.msra.mxu0 %v187_v16 }
  0x15   :  { %189 = vmatprep.subr.bf16.mxu0 %v203_v0 }
  0x18   :  { %191 = vmatpush3.bf16.msra.mxu0 %v190_v19 }
  0x19   :  { %192 = vmatprep.subr.bf16.mxu0 %v203_v0 }
  0x1c   :  { %194 = vmatpush3.bf16.msra.mxu0 %v193_v22 }
  0x1d   :  { %195 = vmatprep.subr.bf16.mxu0 %v203_v0 }
  0x20   :  { %197 = vmatpush3.bf16.msra.mxu0 %v196_v25 }
  0x23   :  { %172 = vmatmul.mubr.f32.vlgmr.msra.gmra.mrb[0].mxu0 %v14_v26 }
  0xf6   :  { %v104_v28 = vpop.f32.mrb[0].mxu0 }
  0xf7   :  { %v105_v29 = vadd.f32 %v121_v27, %v104_v28  ;;  %v173_v30 = vpop.f32.mrb[1].mxu0 }
  0xf9   :  { %v109_v31 = vmul.f32 %v105_v29, %v105_v29  ;;  %v108_v36 = vmul.f32 0.5, %v105_v29 }
  0xfb   :  { %v110_v32 = vmul.f32 %v109_v31, %v105_v29 }
  0xfd   :  { %v111_v33 = vmul.f32 0.044715, %v110_v32 }
  0xff   :  { %v112_v34 = vadd.f32 %v111_v33, %v105_v29 }
 0x101   :  { %201 = vtanh.f32 %v112_v34 }
 0x10b   :  { %v202_v35 = vpop.eup %201 }
 0x10c   :  { %v114_v37 = vadd.f32 1.0, %v202_v35 }
 0x10e   :  { %v115_v38 = vmul.f32 %v114_v37, %v108_v36 }
 0x110   :  { %116 = vst [vmem:[%s286_s3] sm:$0xff] %v115_v38 }

</bundles_post_ra>
